<compile_context>
chip_gen: v5e
topology: v5e:2x2
jax: 0.10.0
libtpu: 0.0.40
codegen_flags: <defaults>
</compile_context>

<pallas_src>
import numpy as np
import jax
import jax.numpy as jnp
from jax.experimental import pallas as pl
from jax.experimental.pallas import tpu as pltpu

# ----------------------------- sizes (small) --------------------------------
B_IMG, C_IN, H, W = 2, 3, 16, 16
KH = KW = 3
FEAT = 32            # vision feature width (stands in for 2048)
HID = 32             # text hidden width    (stands in for 768)
PROJ = 128           # proj_dim             (stands in for 512)
VOCAB = 64
B_TXT, SEQ = 4, 8
HWP = H * W
KDIM = KH * KW * C_IN


# ------------------------------- fused kernel --------------------------------
def retcop_fused_kernel(scale_ref, patches_ref, conv_w_ref, emb_ref, mask_ref,
                        vis_w_ref, txt_w_ref, probs_ref, logits_ref):
    # ---- vision: conv stem as ONE matmul over all images + ReLU + per-image GAP
    # patches_ref: (B_IMG*HWP, KDIM); conv_w_ref: (KDIM, FEAT) with 1/255 folded in
    acts = jnp.dot(patches_ref[...], conv_w_ref[...],
                   preferred_element_type=jnp.float32)            # (B_IMG*HWP, FEAT)
    acts = jnp.maximum(acts, 0.0)                                 # ReLU
    vis_feat = jnp.concatenate(
        [jnp.mean(acts[b * HWP:(b + 1) * HWP], axis=0, keepdims=True)
         for b in range(B_IMG)], axis=0)                          # (B_IMG, FEAT)

    # ---- text: attention-masked mean pooling, whole batch, on the VPU
    # emb_ref: (B_TXT, SEQ, HID); mask_ref: (B_TXT, SEQ)
    mask = mask_ref[...]
    pooled = jnp.sum(mask[:, :, None] * emb_ref[...], axis=1)     # (B_TXT, HID)
    cnt = jnp.maximum(jnp.sum(mask, axis=1, keepdims=True), 1.0)
    txt_feat = pooled / cnt

    # ---- linear projection (no bias) + L2 normalize (rsqrt on EUP, eps as in
    #      F.normalize so a zero row cannot produce NaN)
    def proj_norm(x, w):
        p = jnp.dot(x, w, preferred_element_type=jnp.float32)
        inv = jax.lax.rsqrt(jnp.sum(p * p, axis=-1, keepdims=True) + 1e-12)
        return p * inv

    img_embeds = proj_norm(vis_feat, vis_w_ref[...])              # (B_IMG, PROJ)
    text_embeds = proj_norm(txt_feat, txt_w_ref[...])             # (B_TXT, PROJ)

    # ---- CLIP head: logits = scale * text @ img.T  (== compute_logits(img,txt).t())
    scale = scale_ref[0]
    logits = scale * jax.lax.dot_general(
        text_embeds, img_embeds, (((1,), (1,)), ((), ())),
        preferred_element_type=jnp.float32)                       # (B_TXT, B_IMG)
    logits_ref[...] = logits
    m = jnp.max(logits, axis=-1, keepdims=True)
    e = jnp.exp(logits - m)
    probs_ref[...] = e * pl.reciprocal(jnp.sum(e, axis=-1, keepdims=True),
                                       approx=True)


# ------------------------------ glue / wrapper --------------------------------
def _im2col(x_nhwc):
    # TODO(synk): at real image resolution replace host-side im2col (9x HBM
    # expansion) with in-kernel shifted loads or lax.conv.
    b, h, w, c = x_nhwc.shape
    xp = jnp.pad(x_nhwc, ((0, 0), (1, 1), (1, 1), (0, 0)))
    cols = []
    for di in range(KH):
        for dj in range(KW):
            cols.append(xp[:, di:di + h, dj:dj + w, :])
    patches = jnp.stack(cols, axis=3)                             # (B, H, W, 9, C)
    return patches.reshape(b, h * w, KH * KW * c)


def init_params(key):
    ks = jax.random.split(key, 4)
    conv_w_pt = 0.1 * jax.random.normal(ks[0], (FEAT, C_IN, KH, KW), jnp.float32)
    # PyTorch (Cout, Cin, kh, kw) -> (kh, kw, Cin, Cout) to match im2col order,
    # and fold the image /255 normalization into the linear conv stem.
    conv_w_kf = jnp.transpose(conv_w_pt, (2, 3, 1, 0)).reshape(KH * KW * C_IN, FEAT)
    conv_w_kf = conv_w_kf * (1.0 / 255.0)
    vis_proj = 0.1 * jax.random.normal(ks[1], (FEAT, PROJ), jnp.float32)
    emb_table = 0.1 * jax.random.normal(ks[2], (VOCAB, HID), jnp.float32)
    txt_proj = 0.1 * jax.random.normal(ks[3], (HID, PROJ), jnp.float32)
    logit_scale = jnp.log(jnp.float32(1.0 / 0.07))       # nn.Parameter(log(1/0.07))
    return dict(conv_w=conv_w_kf, vis_proj=vis_proj, emb_table=emb_table,
                txt_proj=txt_proj, logit_scale=logit_scale)


@jax.jit
def retcop_forward(image_nchw, input_ids, attention_mask, params):
    # preprocess_image: /255 is folded into conv_w; image already at target size.
    # TODO(synk): torchvision Resize + F.pad preprocessing not ported.
    x = jnp.transpose(image_nchw.astype(jnp.float32), (0, 2, 3, 1))   # NCHW->NHWC
    patches = _im2col(x).reshape(B_IMG * HWP, KDIM)
    # TODO(synk): HuggingFace tokenizer + BERT transformer stack not ported;
    # embedding gather kept in XLA glue (real port: scalar-prefetch ids + DMA
    # gather rows from an HBM-resident table).
    emb = jnp.take(params["emb_table"], input_ids, axis=0)            # (B_TXT,SEQ,HID)
    mask = attention_mask.astype(jnp.float32)                         # (B_TXT, SEQ)
    scale = jnp.exp(jnp.clip(params["logit_scale"], 0.0, 4.6052)).reshape(1)

    vmem = pl.BlockSpec(memory_space=pltpu.MemorySpace.VMEM)
    smem = pl.BlockSpec(memory_space=pltpu.MemorySpace.SMEM)
    probs, logits = pl.pallas_call(
        retcop_fused_kernel,
        out_shape=(jax.ShapeDtypeStruct((B_TXT, B_IMG), jnp.float32),   # probs
                   jax.ShapeDtypeStruct((B_TXT, B_IMG), jnp.float32)),  # logits
        in_specs=[smem, vmem, vmem, vmem, vmem, vmem, vmem],
        out_specs=(vmem, vmem),
    )(scale, patches, params["conv_w"], emb, mask,
      params["vis_proj"], params["txt_proj"])
    # forward returns (probs, logits) with logits = compute_logits(img, txt).t()
    return probs, logits


# TODO(synk): self.attention (MultiHeadAttention) is built in __init__ but never
# used in forward(); it is intentionally not implemented here.

if __name__ == "__main__":
    key = jax.random.PRNGKey(0)
    k_img, k_tok, k_par = jax.random.split(key, 3)
    image = jax.random.uniform(k_img, (B_IMG, C_IN, H, W), jnp.float32, 0.0, 255.0)
    input_ids = jax.random.randint(k_tok, (B_TXT, SEQ), 0, VOCAB, dtype=jnp.int32)
    attention_mask = jnp.concatenate(
        [jnp.ones((B_TXT, SEQ - 2), jnp.int32), jnp.zeros((B_TXT, 2), jnp.int32)],
        axis=1)
    params = init_params(k_par)

    probs, logits = retcop_forward(image, input_ids, attention_mask, params)
    probs, logits = jax.block_until_ready((probs, logits))

    assert probs.shape == (B_TXT, B_IMG) and logits.shape == (B_TXT, B_IMG)
    assert np.all(np.isfinite(np.asarray(probs))) and np.all(np.isfinite(np.asarray(logits)))
    # tolerance relaxed slightly: softmax denominator uses the EUP approximate
    # reciprocal (pl.reciprocal(..., approx=True)), ~1e-4 relative error.
    np.testing.assert_allclose(np.asarray(probs).sum(-1), np.ones(B_TXT),
                               rtol=2e-3, atol=2e-3)
    print("KERNEL_OK")
</pallas_src>

<mosaic_0001>
module attributes {stable_mosaic.version = 11 : i64} {
  func.func @retcop_fused_kernel(%arg0: memref<1xf32, #tpu.memory_space<smem>>, %arg1: memref<512x27xf32, #tpu.memory_space<vmem>>, %arg2: memref<27x32xf32, #tpu.memory_space<vmem>>, %arg3: memref<4x8x32xf32, #tpu.memory_space<vmem>>, %arg4: memref<4x8xf32, #tpu.memory_space<vmem>>, %arg5: memref<32x128xf32, #tpu.memory_space<vmem>>, %arg6: memref<32x128xf32, #tpu.memory_space<vmem>>, %arg7: memref<4x2xf32, #tpu.memory_space<vmem>>, %arg8: memref<4x2xf32, #tpu.memory_space<vmem>>) attributes {dimension_semantics = [], scalar_prefetch = 0 : i64, scratch_operands = 0 : i64, tpu.core_type = #tpu.core_type<tc>} {
    %c0 = arith.constant 0 : index
    %c0_0 = arith.constant 0 : index
    %0 = vector.load %arg1[%c0, %c0_0] : memref<512x27xf32, #tpu.memory_space<vmem>>, vector<512x27xf32>
    %c0_1 = arith.constant 0 : index
    %c0_2 = arith.constant 0 : index
    %1 = vector.load %arg2[%c0_1, %c0_2] : memref<27x32xf32, #tpu.memory_space<vmem>>, vector<27x32xf32>
    %cst = arith.constant dense<0.000000e+00> : vector<512x32xf32>
    %2 = tpu.matmul %0, %1, %cst {dimension_numbers = #tpu.dot_dimension_numbers<[1], [0], [0], [1], [0, 0, 1, 1], [], []>} : vector<512x27xf32>, vector<27x32xf32>, vector<512x32xf32> -> vector<512x32xf32>
    %cst_3 = arith.constant 0.000000e+00 : f32
    %3 = vector.broadcast %cst_3 : f32 to vector<512x32xf32>
    %4 = arith.maximumf %2, %3 : vector<512x32xf32>
    %5 = vector.extract_strided_slice %4 {offsets = [0, 0], sizes = [256, 32], strides = [1, 1]} : vector<512x32xf32> to vector<256x32xf32>
    %cst_4 = arith.constant dense<0.000000e+00> : vector<32xf32>
    %6 = vector.multi_reduction <add>, %5, %cst_4 [0] : vector<256x32xf32> to vector<32xf32>
    %7 = vector.shape_cast %6 : vector<32xf32> to vector<1x32xf32>
    %cst_5 = arith.constant 2.560000e+02 : f32
    %8 = vector.broadcast %cst_5 : f32 to vector<1x32xf32>
    %9 = arith.divf %7, %8 : vector<1x32xf32>
    %10 = vector.extract_strided_slice %4 {offsets = [256, 0], sizes = [256, 32], strides = [1, 1]} : vector<512x32xf32> to vector<256x32xf32>
    %cst_6 = arith.constant dense<0.000000e+00> : vector<32xf32>
    %11 = vector.multi_reduction <add>, %10, %cst_6 [0] : vector<256x32xf32> to vector<32xf32>
    %12 = vector.shape_cast %11 : vector<32xf32> to vector<1x32xf32>
    %cst_7 = arith.constant 2.560000e+02 : f32
    %13 = vector.broadcast %cst_7 : f32 to vector<1x32xf32>
    %14 = arith.divf %12, %13 : vector<1x32xf32>
    %15 = tpu.concatenate %9, %14 in 0 : vector<1x32xf32>, vector<1x32xf32> -> vector<2x32xf32>
    %c0_8 = arith.constant 0 : index
    %c0_9 = arith.constant 0 : index
    %16 = vector.load %arg4[%c0_8, %c0_9] : memref<4x8xf32, #tpu.memory_space<vmem>>, vector<4x8xf32>
    %17 = vector.shape_cast %16 : vector<4x8xf32> to vector<4x8x1xf32>
    %c0_10 = arith.constant 0 : index
    %c0_11 = arith.constant 0 : index
    %c0_12 = arith.constant 0 : index
    %18 = vector.load %arg3[%c0_10, %c0_11, %c0_12] : memref<4x8x32xf32, #tpu.memory_space<vmem>>, vector<4x8x32xf32>
    %19 = vector.broadcast %17 : vector<4x8x1xf32> to vector<4x8x32xf32>
    %20 = arith.mulf %19, %18 : vector<4x8x32xf32>
    %cst_13 = arith.constant dense<0.000000e+00> : vector<4x32xf32>
    %21 = vector.multi_reduction <add>, %20, %cst_13 [1] : vector<4x8x32xf32> to vector<4x32xf32>
    %cst_14 = arith.constant dense<0.000000e+00> : vector<4xf32>
    %22 = vector.multi_reduction <add>, %16, %cst_14 [1] : vector<4x8xf32> to vector<4xf32>
    %23 = vector.shape_cast %22 : vector<4xf32> to vector<4x1xf32>
    %cst_15 = arith.constant 1.000000e+00 : f32
    %24 = vector.broadcast %cst_15 : f32 to vector<4x1xf32>
    %25 = arith.maximumf %23, %24 : vector<4x1xf32>
    %26 = vector.broadcast %25 : vector<4x1xf32> to vector<4x32xf32>
    %27 = arith.divf %21, %26 : vector<4x32xf32>
    %c0_16 = arith.constant 0 : index
    %c0_17 = arith.constant 0 : index
    %28 = vector.load %arg5[%c0_16, %c0_17] : memref<32x128xf32, #tpu.memory_space<vmem>>, vector<32x128xf32>
    %cst_18 = arith.constant dense<0.000000e+00> : vector<2x128xf32>
    %29 = tpu.matmul %15, %28, %cst_18 {dimension_numbers = #tpu.dot_dimension_numbers<[1], [0], [0], [1], [0, 0, 1, 1], [], []>} : vector<2x32xf32>, vector<32x128xf32>, vector<2x128xf32> -> vector<2x128xf32>
    %30 = arith.mulf %29, %29 : vector<2x128xf32>
    %cst_19 = arith.constant dense<0.000000e+00> : vector<2xf32>
    %31 = vector.multi_reduction <add>, %30, %cst_19 [1] : vector<2x128xf32> to vector<2xf32>
    %32 = vector.shape_cast %31 : vector<2xf32> to vector<2x1xf32>
    %cst_20 = arith.constant 9.99999996E-13 : f32
    %33 = vector.broadcast %cst_20 : f32 to vector<2x1xf32>
    %34 = arith.addf %32, %33 : vector<2x1xf32>
    %35 = math.rsqrt %34 : vector<2x1xf32>
    %36 = vector.broadcast %35 : vector<2x1xf32> to vector<2x128xf32>
    %37 = arith.mulf %29, %36 : vector<2x128xf32>
    %c0_21 = arith.constant 0 : index
    %c0_22 = arith.constant 0 : index
    %38 = vector.load %arg6[%c0_21, %c0_22] : memref<32x128xf32, #tpu.memory_space<vmem>>, vector<32x128xf32>
    %cst_23 = arith.constant dense<0.000000e+00> : vector<4x128xf32>
    %39 = tpu.matmul %27, %38, %cst_23 {dimension_numbers = #tpu.dot_dimension_numbers<[1], [0], [0], [1], [0, 0, 1, 1], [], []>} : vector<4x32xf32>, vector<32x128xf32>, vector<4x128xf32> -> vector<4x128xf32>
    %40 = arith.mulf %39, %39 : vector<4x128xf32>
    %cst_24 = arith.constant dense<0.000000e+00> : vector<4xf32>
    %41 = vector.multi_reduction <add>, %40, %cst_24 [1] : vector<4x128xf32> to vector<4xf32>
    %42 = vector.shape_cast %41 : vector<4xf32> to vector<4x1xf32>
    %cst_25 = arith.constant 9.99999996E-13 : f32
    %43 = vector.broadcast %cst_25 : f32 to vector<4x1xf32>
    %44 = arith.addf %42, %43 : vector<4x1xf32>
    %45 = math.rsqrt %44 : vector<4x1xf32>
    %46 = vector.broadcast %45 : vector<4x1xf32> to vector<4x128xf32>
    %47 = arith.mulf %39, %46 : vector<4x128xf32>
    %c0_26 = arith.constant 0 : index
    %48 = memref.load %arg0[%c0_26] : memref<1xf32, #tpu.memory_space<smem>>
    %cst_27 = arith.constant dense<0.000000e+00> : vector<4x2xf32>
    %49 = tpu.matmul %47, %37, %cst_27 {dimension_numbers = #tpu.dot_dimension_numbers<[1], [1], [0], [0], [0, 0, 1, 0], [], []>} : vector<4x128xf32>, vector<2x128xf32>, vector<4x2xf32> -> vector<4x2xf32>
    %50 = vector.broadcast %48 : f32 to vector<4x2xf32>
    %51 = arith.mulf %50, %49 : vector<4x2xf32>
    %c0_28 = arith.constant 0 : index
    %c0_29 = arith.constant 0 : index
    %52 = vector.load %arg8[%c0_28, %c0_29] : memref<4x2xf32, #tpu.memory_space<vmem>>, vector<4x2xf32>
    tpu.vector_store %arg8[%c0_28, %c0_29], %51 {strides = array<i32>} : memref<4x2xf32, #tpu.memory_space<vmem>>, vector<4x2xf32>,
    %cst_30 = arith.constant dense<0xFF800000> : vector<4xf32>
    %53 = vector.multi_reduction <maximumf>, %51, %cst_30 [1] : vector<4x2xf32> to vector<4xf32>
    %54 = vector.shape_cast %53 : vector<4xf32> to vector<4x1xf32>
    %55 = vector.broadcast %54 : vector<4x1xf32> to vector<4x2xf32>
    %56 = arith.subf %51, %55 : vector<4x2xf32>
    %57 = math.exp %56 : vector<4x2xf32>
    %cst_31 = arith.constant dense<0.000000e+00> : vector<4xf32>
    %58 = vector.multi_reduction <add>, %57, %cst_31 [1] : vector<4x2xf32> to vector<4xf32>
    %59 = vector.shape_cast %58 : vector<4xf32> to vector<4x1xf32>
    %60 = tpu.reciprocal %59 {approx = true} : vector<4x1xf32> -> vector<4x1xf32>
    %61 = vector.broadcast %60 : vector<4x1xf32> to vector<4x2xf32>
    %62 = arith.mulf %57, %61 : vector<4x2xf32>
    %c0_32 = arith.constant 0 : index
    %c0_33 = arith.constant 0 : index
    %63 = vector.load %arg7[%c0_32, %c0_33] : memref<4x2xf32, #tpu.memory_space<vmem>>, vector<4x2xf32>
    tpu.vector_store %arg7[%c0_32, %c0_33], %62 {strides = array<i32>} : memref<4x2xf32, #tpu.memory_space<vmem>>, vector<4x2xf32>,
    return
  }
}

</mosaic_0001>

<bundles_post_ra>
// kernel: retcop_forward.1
= control target key start
LH: loop header
LB: loop body
LE: loop exit
PB: predicated region body
PF: predicated region fallthrough
CT: control target
= control target key end

     0   :  { %vm290_vm0 = vcmask 1042432   ;;  %v719_v3 = vlaneseq  ;;  %vm782_vm1 = vcmask 60416   ;;  %vm97_vm2 = vcmask 220160   ;;  %s1778_s2 = inlined_call_operand.vmem [shape: f32[27,32], index: 2, kind: input, shape index: {}]   ;;  %s1779_s4 = inlined_call_operand.vmem [shape: f32[4,8], index: 4, kind: input, shape index: {}]   ;;  %s1780_s1 = inlined_call_operand.vmem [shape: f32[512,27], index: 1, kind: input, shape index: {}]   ;;  %s1781_s3 = inlined_call_operand.vmem [shape: f32[4,8,32], index: 3, kind: input, shape index: {}]   ;;  %s1782_s6 = inlined_call_operand.vmem [shape: f32[32,128], index: 6, kind: input, shape index: {}]   ;;  %s1783_s5 = inlined_call_operand.vmem [shape: f32[32,128], index: 5, kind: input, shape index: {}]   ;;  %s1784_s0 = inlined_call_operand.<no memory space> [shape: f32[1], index: 0, kind: input, shape index: {}]   ;;  %s1785_s8 = inlined_call_operand.vmem [shape: f32[4,2], index: 8, kind: output, shape index: {1}]   ;;  %s1786_s7 = inlined_call_operand.vmem [shape: f32[4,2], index: 7, kind: output, shape index: {0}]  }
   0x1   :  { %v96_v0 = vld [vmem:[%s1778_s2 + $0x18] sm:$0x7]  ;;  %v95_v1 = vld [vmem:[%s1778_s2 + $0x10] sm:$0xff]  ;;  %v94_v2 = vld [vmem:[%s1778_s2 + $0x8] sm:$0xff]  ;;  %vm567_vm3 = vcmask 261120  }
   0x2   :  { %1000 = vmatpush.msk.msra.mxu0 %vm290_vm0, %v96_v0  ;;  %1067 = vmatpush.msk.msra.mxu1 %vm290_vm0, %v96_v0  ;;  %v93_v4 = vld [vmem:[%s1778_s2] sm:$0xff]  ;;  %v46_v7 = vld [vmem:[%s1780_s1 + $0x88] sm:$0xff]  ;;  %v720_v10 = vshrl.u32 %v719_v3, 7  ;;  %v47_v12 = vld [vmem:[%s1780_s1 + $0x90] sm:$0xff] }
   0x3   :  { %1068 = vmatpush.msk.msra.mxu2 %vm290_vm0, %v96_v0  ;;  %1069 = vmatpush.msk.msra.mxu3 %vm290_vm0, %v96_v0  ;;  %v717_v5 = vld [vmem:[%s1779_s4] sm:$0xf]  ;;  %v62_v8 = vld [vmem:[%s1780_s1 + $0x108] sm:$0xff]  ;;  %v63_v13 = vld [vmem:[%s1780_s1 + $0x110] sm:$0xff] }
   0x4   :  { %307 = vmatpush.msra.mxu0 %v95_v1  ;;  %1070 = vmatpush.msra.mxu1 %v95_v1  ;;  %v29_v6 = vld [vmem:[%s1780_s1] sm:$0xff]  ;;  %v783_v9 = vsel %vm782_vm1, %v717_v5, 0.0  ;;  %v30_v11 = vld [vmem:[%s1780_s1 + $0x8] sm:$0xff]  ;;  %v732_v14 = vperm.slane %v717_v5, 2  ;;  %v31_v15 = vld [vmem:[%s1780_s1 + $0x10] sm:$0xff]  ;;  %v739_v17 = vperm.slane %v717_v5, 3 }
   0x5   :  { %1071 = vmatpush.msra.mxu2 %v95_v1  ;;  %1072 = vmatpush.msra.mxu3 %v95_v1  ;;  %v48_v16 = vld [vmem:[%s1780_s1 + $0x98] sm:$0xff]  ;;  %v718_v19 = vperm.slane %v717_v5, 0  ;;  %v77_v20 = vld [vmem:[%s1780_s1 + $0x180] sm:$0xff]  ;;  %v725_v21 = vperm.slane %v717_v5, 1  ;;  %v78_v25 = vld [vmem:[%s1780_s1 + $0x188] sm:$0xff] }
   0x6   :  { %308 = vmatpush.msra.mxu0 %v94_v2  ;;  %1073 = vmatpush.msra.mxu1 %v94_v2  ;;  %v64_v18 = vld [vmem:[%s1780_s1 + $0x118] sm:$0xff]  ;;  %v49_v23 = vld [vmem:[%s1780_s1 + $0xa0] sm:$0xff]  ;;  %v50_v27 = vld [vmem:[%s1780_s1 + $0xa8] sm:$0xff] }
   0x7   :  { %1074 = vmatpush.msra.mxu2 %v94_v2  ;;  %1075 = vmatpush.msra.mxu3 %v94_v2  ;;  %v32_v22 = vld [vmem:[%s1780_s1 + $0x18] sm:$0xff]  ;;  %v65_v24 = vld [vmem:[%s1780_s1 + $0x120] sm:$0xff]  ;;  %v66_v28 = vld [vmem:[%s1780_s1 + $0x128] sm:$0xff] }
   0x8   :  { %309 = vmatpush.msra.mxu0 %v93_v4  ;;  %1076 = vmatpush.msra.mxu1 %v93_v4  ;;  %v33_v26 = vld [vmem:[%s1780_s1 + $0x20] sm:$0xff]  ;;  %v79_v29 = vld [vmem:[%s1780_s1 + $0x190] sm:$0xff]  ;;  %v34_v30 = vld [vmem:[%s1780_s1 + $0x28] sm:$0xff] }
   0x9   :  { %1001 = vmatmul.msk.f32.vlgmr.msra.gmra.mxu0 %vm97_vm2, %v29_v6  ;;  %1018 = vmatmul.msk.f32.vlgmr.msra.gmra.mxu1 %vm97_vm2, %v46_v7  ;;  %v51_v31 = vld [vmem:[%s1780_s1 + $0xb0] sm:$0xff]  ;;  %v80_v33 = vld [vmem:[%s1780_s1 + $0x198] sm:$0xff]  ;;  %v81_v37 = vld [vmem:[%s1780_s1 + $0x1a0] sm:$0xff] }
   0xa   :  { %1077 = vmatpush.msra.mxu2 %v93_v4  ;;  %1078 = vmatpush.msra.mxu3 %v93_v4  ;;  %v67_v32 = vld [vmem:[%s1780_s1 + $0x130] sm:$0xff]  ;;  %v52_v35 = vld [vmem:[%s1780_s1 + $0xb8] sm:$0xff]  ;;  %v53_v39 = vld [vmem:[%s1780_s1 + $0xc0] sm:$0xff] }
   0xb   :  { %1034 = vmatmul.msk.f32.vlgmr.msra.gmra.mxu2 %vm97_vm2, %v62_v8  ;;  %784 = vadd.xlane.f32.xlu0 %v783_v9  ;;  %v35_v34 = vld [vmem:[%s1780_s1 + $0x30] sm:$0xff]  ;;  %v68_v36 = vld [vmem:[%s1780_s1 + $0x138] sm:$0xff]  ;;  %v69_v40 = vld [vmem:[%s1780_s1 + $0x140] sm:$0xff] }
   0xc   :  { %1081 = vset.pattern.permute.xlu1 %v720_v10  ;;  %1080 = vset.pattern.permute.xlu0 %v720_v10  ;;  %v36_v38 = vld [vmem:[%s1780_s1 + $0x38] sm:$0xff]  ;;  %v82_v41 = vld [vmem:[%s1780_s1 + $0x1a8] sm:$0xff]  ;;  %v37_v42 = vld [vmem:[%s1780_s1 + $0x40] sm:$0xff] }
   0xd   :  { %1082 = vset.pattern.permute.xlu2 %v720_v10  ;;  %1049 = vmatmul.msk.f32.vlgmr.msra.gmra.mxu3 %vm97_vm2, %v77_v20  ;;  %v54_v43 = vld [vmem:[%s1780_s1 + $0xc8] sm:$0xff]  ;;  %v83_v45 = vld [vmem:[%s1780_s1 + $0x1b0] sm:$0xff]  ;;  %v84_v49 = vld [vmem:[%s1780_s1 + $0x1b8] sm:$0xff] }
   0xe   :  { %v70_v44 = vld [vmem:[%s1780_s1 + $0x148] sm:$0xff]  ;;  %v55_v47 = vld [vmem:[%s1780_s1 + $0xd0] sm:$0xff]  ;;  %v56_v51 = vld [vmem:[%s1780_s1 + $0xd8] sm:$0xff] }
   0xf   :  { %v38_v46 = vld [vmem:[%s1780_s1 + $0x48] sm:$0xff]  ;;  %v71_v48 = vld [vmem:[%s1780_s1 + $0x150] sm:$0xff]  ;;  %v72_v52 = vld [vmem:[%s1780_s1 + $0x158] sm:$0xff] }
  0x10   :  { %v39_v50 = vld [vmem:[%s1780_s1 + $0x50] sm:$0xff]  ;;  %v85_v53 = vld [vmem:[%s1780_s1 + $0x1c0] sm:$0xff]  ;;  %v40_v54 = vld [vmem:[%s1780_s1 + $0x58] sm:$0xff] }
  0x11   :  { %1002 = vmatmul.msk.f32.gmra.mxu0 %vm97_vm2, %v30_v11  ;;  %1019 = vmatmul.msk.f32.gmra.mxu1 %vm97_vm2, %v47_v12  ;;  %v57_v55 = vld [vmem:[%s1780_s1 + $0xe0] sm:$0xff]  ;;  %v58_v58 = vld [vmem:[%s1780_s1 + $0xe8] sm:$0xff]  ;;  %v59_v62 = vld [vmem:[%s1780_s1 + $0xf0] sm:$0xff] }
  0x12   :  { %v73_v56 = vld [vmem:[%s1780_s1 + $0x160] sm:$0xff]  ;;  %v74_v59 = vld [vmem:[%s1780_s1 + $0x168] sm:$0xff]  ;;  %v75_v63 = vld [vmem:[%s1780_s1 + $0x170] sm:$0xff] }
  0x13   :  { %1035 = vmatmul.msk.f32.gmra.mxu2 %vm97_vm2, %v63_v13  ;;  %v41_v57 = vld [vmem:[%s1780_s1 + $0x60] sm:$0xff]  ;;  %v86_v60 = vld [vmem:[%s1780_s1 + $0x1c8] sm:$0xff]  ;;  %v87_v0 = vld [vmem:[%s1780_s1 + $0x1d0] sm:$0xff] }
  0x14   :  { %737 = vperm.xlu1 %1081, %v732_v14   ;;  %v42_v61 = vld [vmem:[%s1780_s1 + $0x68] sm:$0xff]  ;;  %v749_v1 = vld [vmem:[%s1781_s3 + $0x18] sm:$0xff]  ;;  %v43_v4 = vld [vmem:[%s1780_s1 + $0x70] sm:$0xff] }
  0x15   :  { %744 = vperm.xlu2 %1082, %v739_v17   ;;  %1050 = vmatmul.msk.f32.gmra.mxu3 %vm97_vm2, %v78_v25  ;;  %v60_v5 = vld [vmem:[%s1780_s1 + $0xf8] sm:$0xff]  ;;  %v61_v12 = vld [vmem:[%s1780_s1 + $0x100] sm:$0xff]  ;;  %v901_v20 = vld [vmem:[%s1782_s6 + $0x10] sm:$0xff] }
  0x16   :  { %v76_v8 = vld [vmem:[%s1780_s1 + $0x178] sm:$0xff] }
  0x17   :  { %v88_v9 = vld [vmem:[%s1780_s1 + $0x1d8] sm:$0xff] }
  0x18   :  { %v44_v11 = vld [vmem:[%s1780_s1 + $0x78] sm:$0xff] }
  0x19   :  { %1003 = vmatmul.msk.f32.gmra.mxu0 %vm97_vm2, %v31_v15  ;;  %1020 = vmatmul.msk.f32.gmra.mxu1 %vm97_vm2, %v48_v16  ;;  %v902_v16 = vld [vmem:[%s1782_s6 + $0x18] sm:$0xff] }
  0x1a   :  { %930 = vmatpush.msrb.mxu2 %v902_v16 }
  0x1b   :  { %1036 = vmatmul.msk.f32.gmra.mxu2 %vm97_vm2, %v64_v18 }
  0x1c   :  { %723 = vperm.xlu1 %1081, %v718_v19   ;;  %v89_v19 = vld [vmem:[%s1780_s1 + $0x1e0] sm:$0xff]  ;;  %931 = vmatpush.msrb.mxu2 %v901_v20 }
  0x1d   :  { %1051 = vmatmul.msk.f32.gmra.mxu3 %vm97_vm2, %v79_v29 }
  0x1f   :  { %730 = vperm.xlu0 %1080, %v725_v21  }
  0x21   :  { %1004 = vmatmul.msk.f32.gmra.mxu0 %vm97_vm2, %v32_v22  ;;  %1021 = vmatmul.msk.f32.gmra.mxu1 %vm97_vm2, %v49_v23  ;;  %v900_v23 = vld [vmem:[%s1782_s6 + $0x8] sm:$0xff] }
  0x22   :  { %932 = vmatpush.msrb.mxu2 %v900_v23 }
  0x23   :  { %1037 = vmatmul.msk.f32.gmra.mxu2 %vm97_vm2, %v65_v24  ;;  %v748_v24 = vld [vmem:[%s1781_s3 + $0x10] sm:$0xff] }
  0x25   :  { %1052 = vmatmul.msk.f32.gmra.mxu3 %vm97_vm2, %v80_v33 }
  0x29   :  { %1005 = vmatmul.msk.f32.gmra.mxu0 %vm97_vm2, %v33_v26  ;;  %1022 = vmatmul.msk.f32.gmra.mxu1 %vm97_vm2, %v50_v27  ;;  %v45_v27 = vld [vmem:[%s1780_s1 + $0x80] sm:$0xff] }
  0x2b   :  { %1038 = vmatmul.msk.f32.gmra.mxu2 %vm97_vm2, %v66_v28  ;;  %v899_v28 = vld [vmem:[%s1782_s6] sm:$0xff] }
  0x2c   :  { %933 = vmatpush.msrb.mxu2 %v899_v28 }
  0x2d   :  { %1053 = vmatmul.msk.f32.gmra.mxu3 %vm97_vm2, %v81_v37 }
  0x31   :  { %1006 = vmatmul.msk.f32.gmra.mxu0 %vm97_vm2, %v34_v30  ;;  %1023 = vmatmul.msk.f32.gmra.mxu1 %vm97_vm2, %v51_v31 }
  0x33   :  { %1039 = vmatmul.msk.f32.gmra.mxu2 %vm97_vm2, %v67_v32 }
  0x35   :  { %1054 = vmatmul.msk.f32.gmra.mxu3 %vm97_vm2, %v82_v41 }
  0x39   :  { %1007 = vmatmul.msk.f32.gmra.mxu0 %vm97_vm2, %v35_v34  ;;  %1024 = vmatmul.msk.f32.gmra.mxu1 %vm97_vm2, %v52_v35 }
  0x3b   :  { %1040 = vmatmul.msk.f32.gmra.mxu2 %vm97_vm2, %v68_v36  ;;  %v90_v36 = vld [vmem:[%s1780_s1 + $0x1e8] sm:$0xff] }
  0x3d   :  { %1055 = vmatmul.msk.f32.gmra.mxu3 %vm97_vm2, %v83_v45 }
  0x41   :  { %1008 = vmatmul.msk.f32.gmra.mxu0 %vm97_vm2, %v36_v38  ;;  %1025 = vmatmul.msk.f32.gmra.mxu1 %vm97_vm2, %v53_v39 }
  0x43   :  { %1041 = vmatmul.msk.f32.gmra.mxu2 %vm97_vm2, %v69_v40 }
  0x45   :  { %1056 = vmatmul.msk.f32.gmra.mxu3 %vm97_vm2, %v84_v49 }
  0x49   :  { %1009 = vmatmul.msk.f32.gmra.mxu0 %vm97_vm2, %v37_v42  ;;  %1026 = vmatmul.msk.f32.gmra.mxu1 %vm97_vm2, %v54_v43 }
  0x4b   :  { %1042 = vmatmul.msk.f32.gmra.mxu2 %vm97_vm2, %v70_v44 }
  0x4d   :  { %1057 = vmatmul.msk.f32.gmra.mxu3 %vm97_vm2, %v85_v53 }
  0x51   :  { %1010 = vmatmul.msk.f32.gmra.mxu0 %vm97_vm2, %v38_v46  ;;  %1027 = vmatmul.msk.f32.gmra.mxu1 %vm97_vm2, %v55_v47 }
  0x53   :  { %1043 = vmatmul.msk.f32.gmra.mxu2 %vm97_vm2, %v71_v48 }
  0x55   :  { %1058 = vmatmul.msk.f32.gmra.mxu3 %vm97_vm2, %v86_v60 }
  0x59   :  { %1011 = vmatmul.msk.f32.gmra.mxu0 %vm97_vm2, %v39_v50  ;;  %1028 = vmatmul.msk.f32.gmra.mxu1 %vm97_vm2, %v56_v51  ;;  %v746_v50 = vld [vmem:[%s1781_s3] sm:$0xff] }
  0x5b   :  { %1044 = vmatmul.msk.f32.gmra.mxu2 %vm97_vm2, %v72_v52 }
  0x5d   :  { %1059 = vmatmul.msk.f32.gmra.mxu3 %vm97_vm2, %v87_v0 }
  0x61   :  { %1012 = vmatmul.msk.f32.gmra.mxu0 %vm97_vm2, %v40_v54  ;;  %1029 = vmatmul.msk.f32.gmra.mxu1 %vm97_vm2, %v57_v55 }
  0x63   :  { %1045 = vmatmul.msk.f32.gmra.mxu2 %vm97_vm2, %v73_v56 }
  0x65   :  { %1060 = vmatmul.msk.f32.gmra.mxu3 %vm97_vm2, %v88_v9 }
  0x69   :  { %1013 = vmatmul.msk.f32.gmra.mxu0 %vm97_vm2, %v41_v57  ;;  %1030 = vmatmul.msk.f32.gmra.mxu1 %vm97_vm2, %v58_v58 }
  0x6b   :  { %1046 = vmatmul.msk.f32.gmra.mxu2 %vm97_vm2, %v74_v59  ;;  %v747_v59 = vld [vmem:[%s1781_s3 + $0x8] sm:$0xff] }
  0x6d   :  { %1061 = vmatmul.msk.f32.gmra.mxu3 %vm97_vm2, %v89_v19 }
  0x6f   :  { %v745_v2 = vpop.permute.xlu2 %744 }
  0x70   :  { %v753_v3 = vmul.f32 %v749_v1, %v745_v2 }
  0x71   :  { %1014 = vmatmul.msk.f32.gmra.mxu0 %vm97_vm2, %v42_v61  ;;  %1031 = vmatmul.msk.f32.gmra.mxu1 %vm97_vm2, %v59_v62 }
  0x72   :  { %v775_v6 = vsel %vm567_vm3, %v753_v3, 0.0 }
  0x73   :  { %1047 = vmatmul.msk.f32.gmra.mxu2 %vm97_vm2, %v75_v63  ;;  %v776_v7 = vrot.slane %v775_v6, 4 }
  0x75   :  { %v777_v10 = vadd.f32 %v776_v7, %v775_v6  ;;  %1062 = vmatmul.msk.f32.gmra.mxu3 %vm97_vm2, %v90_v36  ;;  %v91_v7 = vld [vmem:[%s1780_s1 + $0x1f0] sm:$0xff] }
  0x77   :  { %v778_v15 = vrot.slane %v777_v10, 2 }
  0x79   :  { %1015 = vmatmul.msk.f32.gmra.mxu0 %vm97_vm2, %v43_v4  ;;  %1032 = vmatmul.msk.f32.gmra.mxu1 %vm97_vm2, %v60_v5  ;;  %v779_v22 = vadd.f32 %v778_v15, %v777_v10 }
  0x7b   :  { %1048 = vmatmul.msk.f32.gmra.mxu2 %vm97_vm2, %v76_v8  ;;  %v780_v32 = vrot.slane %v779_v22, 1 }
  0x7d   :  { %v1459_v43 = vadd.f32 %v780_v32, %v779_v22  ;;  %1063 = vmatmul.msk.f32.gmra.mxu3 %vm97_vm2, %v91_v7 }
  0x7e   :  { %v785_v13 = vpop.xlane.xlu0 %784 }
  0x7f   :  { %v1400_v14 = vmax.f32 %v785_v13, 1.0 }
  0x81   :  { %1016 = vmatmul.msk.f32.gmra.mxu0 %vm97_vm2, %v44_v11  ;;  %1033 = vmatmul.msk.f32.gmra.mxu1 %vm97_vm2, %v61_v12  ;;  %v1408_v17 = vrot.slane %v1400_v14, 2  ;;  %v1411_v18 = vrot.slane %v1400_v14, 1  ;;  %1083 = vrcp.f32 %v1400_v14  ;;  %v1423_v21 = vrot.slane %v1400_v14, 3 }
  0x82   :  { %v804_v44 = vand.u32 2147483647, %v1400_v14  ;;  %v806_v49 = vand.u32 2147483648, %v1400_v14  ;;  %vm800_vm6 = vweird.f32 %v1400_v14 }
  0x83   :  { %1085 = vrcp.f32 %v1408_v17  ;;  %v834_v46 = vand.u32 2147483647, %v1408_v17  ;;  %v836_v47 = vand.u32 2147483648, %v1408_v17  ;;  %vm830_vm4 = vweird.f32 %v1408_v17 }
  0x84   :  { %1087 = vrcp.f32 %v1411_v18  ;;  %vm815_vm5 = vweird.f32 %v1411_v18  ;;  %v819_v54 = vand.u32 2147483647, %v1411_v18  ;;  %v821_v63 = vand.u32 2147483648, %v1411_v18 }
  0x85   :  { %1089 = vrcp.f32 %v1423_v21  ;;  %vm1487_vm7 = vcmp.eq.f32.partialorder %v834_v46, 8.507059e+37  ;;  %v837_v4 = vor.u32 1.1754944e-38, %v836_v47  ;;  %vm845_vm8 = vweird.f32 %v1423_v21 }
  0x86   :  { %v311_v25 = vpop.f32.mrf.mxu0  ;;  %v1432_v26 = vpop.f32.mrf.mxu1  ;;  %v851_v12 = vand.u32 2147483648, %v1423_v21  ;;  %v822_v47 = vor.u32 1.1754944e-38, %v821_v63 }
  0x87   :  { %v738_v29 = vpop.permute.xlu1 %737  ;;  %v1441_v30 = vpop.eup %1083  ;;  %v503_v35 = vmax.f32 %v311_v25, 0.0 }
  0x88   :  { %v752_v31 = vmul.f32 %v748_v24, %v738_v29  ;;  %v796_v41 = vmul.f32 %v1441_v30, %v1400_v14  ;;  %v849_v24 = vand.u32 2147483647, %v1423_v21  ;;  %vm801_vm13 = vweird.f32 %v1441_v30 }
  0x89   :  { %v1443_v33 = vpop.eup %1085  ;;  %1017 = vmatmul.msk.f32.gmra.mxu0 %vm97_vm2, %v45_v27  ;;  %v568_v51 = vsel %vm567_vm3, %v503_v35, 0.0  ;;  %v807_v29 = vor.u32 1.1754944e-38, %v806_v49  ;;  %vm1545_vm0 = vmor %vm800_vm6, %vm801_vm13  ;;  %vm911_vm6 = vcmask 1042434  }
  0x8a   :  { %v1446_v34 = vpop.eup %1087  ;;  %v826_v37 = vmul.f32 %v1443_v33, %v1408_v17  ;;  %v768_v38 = vsel %vm567_vm3, %v752_v31, 0.0  ;;  %v797_v60 = vsub.f32 1.0, %v796_v41  ;;  %vm831_vm9 = vweird.f32 %v1443_v33 }
  0x8b   :  { %v769_v39 = vrot.slane %v768_v38, 4  ;;  %v811_v40 = vmul.f32 %v1446_v34, %v1411_v18  ;;  %v1462_v45 = vpop.eup %1089  ;;  %vm1506_vm11 = vmor %vm830_vm4, %vm831_vm9  ;;  %vm816_vm12 = vweird.f32 %v1446_v34  ;;  %vm850_vm1 = vcmp.eq.f32.partialorder %v849_v24, 8.507059e+37 }
  0x8c   :  { %v827_v42 = vsub.f32 1.0, %v826_v37  ;;  %v841_v1 = vmul.f32 %v1462_v45, %v1423_v21  ;;  %v798_v11 = vmul.f32 %v1441_v30, %v797_v60  ;;  %vm846_vm10 = vweird.f32 %v1462_v45  ;;  %vm1534_vm15 = vmor %vm815_vm5, %vm816_vm12 }
  0x8d   :  { %v770_v48 = vadd.f32 %v769_v39, %v768_v38  ;;  %v812_v58 = vsub.f32 1.0, %v811_v40  ;;  %vm1523_vm14 = vmor %vm845_vm8, %vm846_vm10  ;;  %v852_v38 = vor.u32 1.1754944e-38, %v851_v12  ;;  %vm820_vm4 = vcmp.eq.f32.partialorder %v819_v54, 8.507059e+37 }
  0x8e   :  { %v314_v52 = vpop.f32.mrf.mxu0  ;;  %v1471_v53 = vpop.f32.mrf.mxu1  ;;  %v828_v62 = vmul.f32 %v1443_v33, %v827_v42  ;;  %v842_v19 = vsub.f32 1.0, %v841_v1  ;;  %v799_v41 = vadd.f32 %v1441_v30, %v798_v11  ;;  %vm805_vm5 = vcmp.eq.f32.partialorder %v804_v44, 8.507059e+37 }
  0x8f   :  { %v504_v55 = vmax.f32 %v314_v52, 0.0  ;;  %v1477_v56 = vpop.f32.mrf.mxu2  ;;  %v771_v57 = vrot.slane %v770_v48, 2  ;;  %v724_v61 = vpop.permute.xlu1 %723  ;;  %v813_v10 = vmul.f32 %v1446_v34, %v812_v58  ;;  %vm939_vm8 = vcmask 1043456  }
  0x90   :  { %v750_v0 = vmul.f32 %v746_v50, %v724_v61  ;;  %v829_v13 = vadd.f32 %v1443_v33, %v828_v62  ;;  %v843_v31 = vmul.f32 %v1462_v45, %v842_v19  ;;  %v92_v50 = vld [vmem:[%s1780_s1 + $0x1f8] sm:$0xff]  ;;  %v803_v60 = vsel %vm1545_vm0, %v1441_v30, %v799_v41  ;;  %v1574_v7 = vpop.f32.mrf.mxu3 }
  0x91   :  { %v569_v2 = vsel %vm567_vm3, %v504_v55, 0.0  ;;  %v731_v5 = vpop.permute.xlu0 %730  ;;  %v772_v8 = vadd.f32 %v771_v57, %v770_v48  ;;  %v814_v35 = vadd.f32 %v1446_v34, %v813_v10  ;;  %1064 = vmatmul.msk.f32.gmra.mxu3 %vm97_vm2, %v92_v50  ;;  %vm908_vm2 = vcmask 1041409  }
  0x92   :  { %v570_v6 = vadd.f32 %v569_v2, %v568_v51  ;;  %v751_v9 = vmul.f32 %v747_v59, %v731_v5  ;;  %v754_v16 = vsel %vm567_vm3, %v750_v0, 0.0  ;;  %v833_v39 = vsel %vm1506_vm11, %v1443_v33, %v829_v13 }
  0x93   :  { %v755_v23 = vrot.slane %v754_v16, 4  ;;  %v773_v28 = vrot.slane %v772_v8, 1  ;;  %v844_v42 = vadd.f32 %v1462_v45, %v843_v31  ;;  %v838_v57 = vsel %vm1487_vm7, %v837_v4, %v833_v39 }
  0x94   :  { %v761_v15 = vsel %vm567_vm3, %v751_v9, 0.0  ;;  %v818_v58 = vsel %vm1534_vm15, %v1446_v34, %v814_v35  ;;  %v808_v4 = vsel %vm805_vm5, %v807_v29, %v803_v60  ;;  %vm914_vm7 = vcmask 1043459  }
  0x95   :  { %v762_v22 = vrot.slane %v761_v15, 4  ;;  %v756_v21 = vadd.f32 %v755_v23, %v754_v16  ;;  %v774_v51 = vadd.f32 %v773_v28, %v772_v8  ;;  %v848_v55 = vsel %vm1523_vm14, %v1462_v45, %v844_v42 }
  0x96   :  { %v317_v25 = vpop.f32.mrf.mxu0  ;;  %v1512_v27 = vpop.f32.mrf.mxu1  ;;  %v853_v61 = vsel %vm850_vm1, %v852_v38, %v848_v55  ;;  %v823_v2 = vsel %vm820_vm4, %v822_v47, %v818_v58  ;;  %vm715_vm10 = vcmask 1040384   ;;  %vm883_vm11 = vcmask 1041408  }
  0x97   :  { %v505_v17 = vmax.f32 %v317_v25, 0.0  ;;  %v1516_v32 = vpop.f32.mrf.mxu2  ;;  %v763_v36 = vadd.f32 %v762_v22, %v761_v15  ;;  %v757_v52 = vrot.slane %v756_v21, 2  ;;  %v839_v1 = vmul.f32 %v838_v57, %v774_v51 }
  0x98   :  { %v854_v5 = vmul.f32 %v853_v61, %v1459_v43  ;;  %v1582_v24 = vpop.f32.mrf.mxu3  ;;  %vm978_vm1 = vcmask 11264  }
  0x99   :  { %v571_v46 = vsel %vm567_vm3, %v505_v17, 0.0  ;;  %v764_v48 = vrot.slane %v763_v36, 2  ;;  %v758_v45 = vadd.f32 %v757_v52, %v756_v21  ;;  %v910_v8 = vrot.slane %v839_v1, 6 }
  0x9a   :  { %v572_v49 = vadd.f32 %v571_v46, %v570_v6  ;;  %v913_v11 = vrot.slane %v854_v5, 5 }
  0x9b   :  { %v765_v59 = vadd.f32 %v764_v48, %v763_v36  ;;  %v759_v34 = vrot.slane %v758_v45, 1 }
  0x9d   :  { %v766_v62 = vrot.slane %v765_v59, 1  ;;  %v760_v30 = vadd.f32 %v759_v34, %v758_v45 }
  0x9e   :  { %v320_v63 = vpop.f32.mrf.mxu0  ;;  %v1568_v0 = vpop.f32.mrf.mxu1 }
  0x9f   :  { %v506_v3 = vmax.f32 %v320_v63, 0.0  ;;  %v1570_v18 = vpop.f32.mrf.mxu2  ;;  %v767_v54 = vadd.f32 %v766_v62, %v765_v59  ;;  %v809_v9 = vmul.f32 %v808_v4, %v760_v30 }
  0xa0   :  { %v1589_v36 = vpop.f32.mrf.mxu3 }
  0xa1   :  { %v573_v14 = vsel %vm567_vm3, %v506_v3, 0.0  ;;  %v824_v44 = vmul.f32 %v823_v2, %v767_v54 }
  0xa2   :  { %v574_v6 = vadd.f32 %v573_v14, %v572_v49 }
  0xa3   :  { %v907_v10 = vrot.slane %v824_v44, 7 }
  0xa5   :  { %v909_v12 = vsel %vm908_vm2, %v907_v10, %v809_v9 }
  0xa6   :  { %v323_v13 = vpop.f32.mrf.mxu0  ;;  %v1576_v15 = vpop.f32.mrf.mxu1  ;;  %v912_v16 = vsel %vm911_vm6, %v910_v8, %v909_v12 }
  0xa7   :  { %v507_v43 = vmax.f32 %v323_v13, 0.0  ;;  %v1578_v19 = vpop.f32.mrf.mxu2  ;;  %v915_v20 = vsel %vm914_vm7, %v913_v11, %v912_v16 }
  0xa8   :  { %1066 = vmatmul.msk.f32.vlgmr.msrb.gmra.mxu2 %vm567_vm3, %v915_v20  ;;  %v1595_v40 = vpop.f32.mrf.mxu3 }
  0xa9   :  { %v575_v22 = vsel %vm567_vm3, %v507_v43, 0.0 }
  0xaa   :  { %v576_v23 = vadd.f32 %v575_v22, %v574_v6 }
  0xae   :  { %v326_v25 = vpop.f32.mrf.mxu0  ;;  %v1584_v28 = vpop.f32.mrf.mxu1 }
  0xaf   :  { %v508_v29 = vmax.f32 %v326_v25, 0.0  ;;  %v1586_v31 = vpop.f32.mrf.mxu2 }
  0xb0   :  { %v1601_v46 = vpop.f32.mrf.mxu3 }
  0xb1   :  { %v577_v17 = vsel %vm567_vm3, %v508_v29, 0.0  ;;  %v536_v29 = vmax.f32 %v1477_v56, 0.0  ;;  %v538_v56 = vmax.f32 %v1570_v18, 0.0  ;;  %v540_v18 = vmax.f32 %v1586_v31, 0.0 }
  0xb2   :  { %v578_v35 = vadd.f32 %v577_v17, %v576_v23 }
  0xb6   :  { %v329_v37 = vpop.f32.mrf.mxu0  ;;  %v1591_v38 = vpop.f32.mrf.mxu1 }
  0xb7   :  { %v1593_v39 = vpop.f32.mrf.mxu2  ;;  %v509_v54 = vmax.f32 %v329_v37, 0.0 }
  0xb8   :  { %v1609_v51 = vpop.f32.mrf.mxu3 }
  0xb9   :  { %v579_v5 = vsel %vm567_vm3, %v509_v54, 0.0 }
  0xba   :  { %v580_v8 = vadd.f32 %v579_v5, %v578_v35 }
  0xbe   :  { %v332_v41 = vpop.f32.mrf.mxu0  ;;  %v1597_v21 = vpop.f32.mrf.mxu1 }
  0xbf   :  { %v1599_v42 = vpop.f32.mrf.mxu2  ;;  %v510_v4 = vmax.f32 %v332_v41, 0.0 }
  0xc0   :  { %v1615_v58 = vpop.f32.mrf.mxu3  ;;  %v542_v31 = vmax.f32 %v1599_v42, 0.0  ;;  %v523_v42 = vmax.f32 %v1568_v0, 0.0  ;;  %v525_v0 = vmax.f32 %v1584_v28, 0.0  ;;  %v527_v28 = vmax.f32 %v1597_v21, 0.0 }
  0xc1   :  { %v581_v14 = vsel %vm567_vm3, %v510_v4, 0.0 }
  0xc2   :  { %v582_v13 = vadd.f32 %v581_v14, %v580_v8  ;;  %v615_v21 = vsel %vm567_vm3, %v527_v28, 0.0  ;;  %v557_v28 = vmax.f32 %v1615_v58, 0.0 }
  0xc4   :  { %v688_v58 = vsel %vm567_vm3, %v557_v28, 0.0 }
  0xc6   :  { %v335_v47 = vpop.f32.mrf.mxu0  ;;  %v1603_v48 = vpop.f32.mrf.mxu1 }
  0xc7   :  { %v1605_v33 = vpop.f32.mrf.mxu2  ;;  %v511_v30 = vmax.f32 %v335_v47, 0.0 }
  0xc8   :  { %v1621_v61 = vpop.f32.mrf.mxu3 }
  0xc9   :  { %v583_v11 = vsel %vm567_vm3, %v511_v30, 0.0 }
  0xca   :  { %v584_v22 = vadd.f32 %v583_v11, %v582_v13 }
  0xce   :  { %v338_v49 = vpop.f32.mrf.mxu0  ;;  %v1607_v50 = vpop.f32.mrf.mxu1 }
  0xcf   :  { %v1613_v57 = vpop.f32.mrf.mxu2  ;;  %v512_v44 = vmax.f32 %v338_v49, 0.0 }
  0xd0   :  { %v1627_v2 = vpop.f32.mrf.mxu3 }
  0xd1   :  { %v585_v43 = vsel %vm567_vm3, %v512_v44, 0.0 }
  0xd2   :  { %v586_v17 = vadd.f32 %v585_v43, %v584_v22  ;;  %v650_v22 = vsel %vm567_vm3, %v538_v56, 0.0  ;;  %v522_v56 = vmax.f32 %v1512_v27, 0.0 }
  0xd4   :  { %v605_v27 = vsel %vm567_vm3, %v522_v56, 0.0 }
  0xd6   :  { %v341_v52 = vpop.f32.mrf.mxu0  ;;  %v1611_v55 = vpop.f32.mrf.mxu1 }
  0xd7   :  { %v1619_v45 = vpop.f32.mrf.mxu2  ;;  %v513_v12 = vmax.f32 %v341_v52, 0.0  ;;  %v537_v52 = vmax.f32 %v1516_v32, 0.0 }
  0xd8   :  { %v1638_v16 = vpop.f32.mrf.mxu3 }
  0xd9   :  { %v587_v23 = vsel %vm567_vm3, %v513_v12, 0.0  ;;  %v648_v32 = vsel %vm567_vm3, %v537_v52, 0.0  ;;  %v521_v52 = vmax.f32 %v1471_v53, 0.0 }
  0xda   :  { %v588_v41 = vadd.f32 %v587_v23, %v586_v17 }
  0xde   :  { %v344_v59 = vpop.f32.mrf.mxu0  ;;  %v1617_v60 = vpop.f32.mrf.mxu1 }
  0xdf   :  { %v1625_v1 = vpop.f32.mrf.mxu2  ;;  %v514_v20 = vmax.f32 %v344_v59, 0.0  ;;  %v646_v59 = vsel %vm567_vm3, %v536_v29, 0.0 }
  0xe0   :  { %v1652_v12 = vpop.f32.mrf.mxu3 }
  0xe1   :  { %v589_v35 = vsel %vm567_vm3, %v514_v20, 0.0 }
  0xe2   :  { %v590_v30 = vadd.f32 %v589_v35, %v588_v41  ;;  %v520_v35 = vmax.f32 %v1432_v26, 0.0  ;;  %v541_v41 = vmax.f32 %v1593_v39, 0.0 }
  0xe4   :  { %v601_v26 = vsel %vm567_vm3, %v520_v35, 0.0  ;;  %v656_v39 = vsel %vm567_vm3, %v541_v41, 0.0 }
  0xe6   :  { %v347_v62 = vpop.f32.mrf.mxu0  ;;  %v1623_v63 = vpop.f32.mrf.mxu1 }
  0xe7   :  { %v1633_v6 = vpop.f32.mrf.mxu2  ;;  %v515_v25 = vmax.f32 %v347_v62, 0.0 }
  0xe8   :  { %v1671_v53 = vpop.f32.mrf.mxu3 }
  0xe9   :  { %v591_v54 = vsel %vm567_vm3, %v515_v25, 0.0 }
  0xea   :  { %v592_v8 = vadd.f32 %v591_v54, %v590_v30  ;;  %v654_v54 = vsel %vm567_vm3, %v540_v18, 0.0 }
  0xee   :  { %v350_v34 = vpop.f32.mrf.mxu0  ;;  %v1629_v3 = vpop.f32.mrf.mxu1 }
  0xef   :  { %v516_v37 = vmax.f32 %v350_v34, 0.0  ;;  %v1647_v14 = vpop.f32.mrf.mxu2 }
  0xf1   :  { %v593_v62 = vsel %vm567_vm3, %v516_v37, 0.0 }
  0xf2   :  { %v594_v43 = vadd.f32 %v593_v62, %v592_v8  ;;  %v543_v62 = vmax.f32 %v1605_v33, 0.0  ;;  %v603_v8 = vsel %vm567_vm3, %v521_v52, 0.0 }
  0xf4   :  { %v660_v33 = vsel %vm567_vm3, %v543_v62, 0.0  ;;  %v529_v62 = vmax.f32 %v1607_v50, 0.0 }
  0xf6   :  { %v353_v9 = vpop.f32.mrf.mxu0  ;;  %v1635_v10 = vpop.f32.mrf.mxu1  ;;  %v619_v50 = vsel %vm567_vm3, %v529_v62, 0.0 }
  0xf7   :  { %v517_v4 = vmax.f32 %v353_v9, 0.0  ;;  %v539_v9 = vmax.f32 %v1578_v19, 0.0  ;;  %v449_v30 = vpop.f32.mrf.mxu2 }
  0xf9   :  { %v595_v13 = vsel %vm567_vm3, %v517_v4, 0.0  ;;  %v652_v37 = vsel %vm567_vm3, %v539_v9, 0.0 }
  0xfa   :  { %v596_v25 = vadd.f32 %v595_v13, %v594_v43  ;;  %v524_v43 = vmax.f32 %v1576_v15, 0.0 }
  0xfc   :  { %v609_v15 = vsel %vm567_vm3, %v524_v43, 0.0 }
  0xfe   :  { %v356_v47 = vpop.f32.mrf.mxu0  ;;  %v407_v49 = vpop.f32.mrf.mxu1 }
  0xff   :  { %v535_v5 = vmax.f32 %v407_v49, 0.0  ;;  %v518_v44 = vmax.f32 %v356_v47, 0.0 }
 0x101   :  { %v645_v34 = vsel %vm567_vm3, %v535_v5, 0.0  ;;  %v597_v23 = vsel %vm567_vm3, %v518_v44, 0.0 }
 0x102   :  { %v647_v11 = vadd.f32 %v646_v59, %v645_v34  ;;  %v598_v47 = vadd.f32 %v597_v23, %v596_v25  ;;  %v607_v23 = vsel %vm567_vm3, %v523_v42, 0.0 }
 0x104   :  { %v649_v20 = vadd.f32 %v648_v32, %v647_v11  ;;  %v658_v11 = vsel %vm567_vm3, %v542_v31, 0.0  ;;  %v544_v32 = vmax.f32 %v1613_v57, 0.0  ;;  %v546_v57 = vmax.f32 %v1625_v1, 0.0 }
 0x105   :  { %v548_v1 = vmax.f32 %v1647_v14, 0.0 }
 0x106   :  { %v651_v29 = vadd.f32 %v650_v22, %v649_v20  ;;  %v359_v17 = vpop.f32.mrf.mxu0  ;;  %v545_v20 = vmax.f32 %v1619_v45, 0.0  ;;  %v662_v25 = vsel %vm567_vm3, %v544_v32, 0.0  ;;  %v547_v45 = vmax.f32 %v1633_v6, 0.0 }
 0x107   :  { %v519_v19 = vmax.f32 %v359_v17, 0.0  ;;  %v666_v52 = vsel %vm567_vm3, %v546_v57, 0.0  ;;  %v670_v14 = vsel %vm567_vm3, %v548_v1, 0.0  ;;  %v533_v57 = vmax.f32 %v1629_v3, 0.0 }
 0x108   :  { %v653_v49 = vadd.f32 %v652_v37, %v651_v29  ;;  %v526_v29 = vmax.f32 %v1591_v38, 0.0  ;;  %v664_v37 = vsel %vm567_vm3, %v545_v20, 0.0  ;;  %v668_v6 = vsel %vm567_vm3, %v547_v45, 0.0 }
 0x109   :  { %v599_v4 = vsel %vm567_vm3, %v519_v19, 0.0  ;;  %v553_v20 = vmax.f32 %v1589_v36, 0.0 }
 0x10a   :  { %v655_v5 = vadd.f32 %v654_v54, %v653_v49  ;;  %v600_v59 = vadd.f32 %v599_v4, %v598_v47  ;;  %v452_v47 = vpop.f32.mrf.mxu2  ;;  %v611_v49 = vsel %vm567_vm3, %v525_v0, 0.0  ;;  %v613_v38 = vsel %vm567_vm3, %v526_v29, 0.0  ;;  %v1694_v4 = vpop.f32.mrf.mxu3 }
 0x10b   :  { %v680_v36 = vsel %vm567_vm3, %v553_v20, 0.0 }
 0x10c   :  { %v657_v44 = vadd.f32 %v656_v39, %v655_v5  ;;  %v602_v34 = vadd.f32 %v601_v26, %v600_v59  ;;  %v528_v5 = vmax.f32 %v1603_v48, 0.0  ;;  %v549_v59 = vmax.f32 %v449_v30, 0.0 }
 0x10d   :  { %v550_v26 = vmax.f32 %v452_v47, 0.0  ;;  %v530_v48 = vmax.f32 %v1611_v55, 0.0 }
 0x10e   :  { %v659_v9 = vadd.f32 %v658_v11, %v657_v44  ;;  %v604_v13 = vadd.f32 %v603_v8, %v602_v34  ;;  %v551_v44 = vmax.f32 %v1574_v7, 0.0  ;;  %v617_v42 = vsel %vm567_vm3, %v528_v5, 0.0  ;;  %v857_v5 = vld [vmem:[%s1783_s5 + $0x10] sm:$0xff] }
 0x10f   :  { %v672_v11 = vsel %vm567_vm3, %v549_v59, 0.0  ;;  %v674_v30 = vsel %vm567_vm3, %v550_v26, 0.0  ;;  %v621_v55 = vsel %vm567_vm3, %v530_v48, 0.0 }
 0x110   :  { %v661_v22 = vadd.f32 %v660_v33, %v659_v9  ;;  %v606_v18 = vadd.f32 %v605_v27, %v604_v13  ;;  %v552_v13 = vmax.f32 %v1582_v24, 0.0  ;;  %v531_v27 = vmax.f32 %v1617_v60, 0.0 }
 0x111   :  { %v676_v33 = vsel %vm567_vm3, %v551_v44, 0.0 }
 0x112   :  { %v663_v17 = vadd.f32 %v662_v25, %v661_v22  ;;  %v608_v35 = vadd.f32 %v607_v23, %v606_v18  ;;  %v532_v22 = vmax.f32 %v1623_v63, 0.0  ;;  %v1713_v23 = vpop.f32.mrf.mxu3  ;;  %v678_v24 = vsel %vm567_vm3, %v552_v13, 0.0 }
 0x113   :  { %v554_v25 = vmax.f32 %v1595_v40, 0.0  ;;  %v623_v60 = vsel %vm567_vm3, %v531_v27, 0.0  ;;  %v556_v40 = vmax.f32 %v1609_v51, 0.0  ;;  %v858_v51 = vld [vmem:[%s1783_s5 + $0x18] sm:$0xff]  ;;  %v564_v27 = vmax.f32 %v1713_v23, 0.0 }
 0x114   :  { %v665_v41 = vadd.f32 %v664_v37, %v663_v17  ;;  %v610_v19 = vadd.f32 %v609_v15, %v608_v35  ;;  %v555_v35 = vmax.f32 %v1601_v46, 0.0  ;;  %v625_v63 = vsel %vm567_vm3, %v532_v22, 0.0  ;;  %874 = vmatpush.msrb.mxu1 %v858_v51 }
 0x115   :  { %v534_v15 = vmax.f32 %v1635_v10, 0.0  ;;  %v686_v10 = vsel %vm567_vm3, %v556_v40, 0.0 }
 0x116   :  { %v667_v54 = vadd.f32 %v666_v52, %v665_v41  ;;  %v612_v31 = vadd.f32 %v611_v49, %v610_v19  ;;  %v682_v41 = vsel %vm567_vm3, %v554_v25, 0.0  ;;  %v627_v19 = vsel %vm567_vm3, %v533_v57, 0.0  ;;  %875 = vmatpush.msrb.mxu1 %v857_v5 }
 0x117   :  { %v684_v49 = vsel %vm567_vm3, %v555_v35, 0.0  ;;  %v629_v46 = vsel %vm567_vm3, %v534_v15, 0.0 }
 0x118   :  { %v669_v56 = vadd.f32 %v668_v6, %v667_v54  ;;  %v614_v39 = vadd.f32 %v613_v38, %v612_v31  ;;  %v558_v38 = vmax.f32 %v1621_v61, 0.0  ;;  %v559_v6 = vmax.f32 %v1627_v2, 0.0  ;;  %v856_v61 = vld [vmem:[%s1783_s5 + $0x8] sm:$0xff]  ;;  %v855_v2 = vld [vmem:[%s1783_s5] sm:$0xff] }
 0x119   :  { %876 = vmatpush.msrb.mxu1 %v856_v61 }
 0x11a   :  { %v616_v34 = vadd.f32 %v615_v21, %v614_v39  ;;  %v671_v8 = vadd.f32 %v670_v14, %v669_v56  ;;  %v497_v31 = vpop.f32.mrf.mxu3  ;;  %v690_v39 = vsel %vm567_vm3, %v558_v38, 0.0  ;;  %v560_v21 = vmax.f32 %v1638_v16, 0.0 }
 0x11b   :  { %v692_v44 = vsel %vm567_vm3, %v559_v6, 0.0  ;;  %v562_v16 = vmax.f32 %v1671_v53, 0.0  ;;  %877 = vmatpush.msrb.mxu1 %v855_v2  ;;  %v565_v20 = vmax.f32 %v497_v31, 0.0 }
 0x11c   :  { %v618_v32 = vadd.f32 %v617_v42, %v616_v34  ;;  %v673_v9 = vadd.f32 %v672_v11, %v671_v8  ;;  %v561_v34 = vmax.f32 %v1652_v12, 0.0  ;;  %v1101_v42 = vmov 256.0  }
 0x11d   :  { %1091 = vrcp.f32 %v1101_v42  ;;  %v694_v48 = vsel %vm567_vm3, %v560_v21, 0.0  ;;  %v698_v12 = vsel %vm567_vm3, %v562_v16, 0.0  ;;  %v976_v16 = vstv %s1784_s0 }
 0x11e   :  { %v620_v43 = vadd.f32 %v619_v50, %v618_v32  ;;  %v675_v7 = vadd.f32 %v674_v30, %v673_v9  ;;  %v696_v30 = vsel %vm567_vm3, %v561_v34, 0.0  ;;  %v563_v32 = vmax.f32 %v1694_v4, 0.0 }
 0x11f   :  { %v704_v4 = vsel %vm567_vm3, %v565_v20, 0.0 }
 0x120   :  { %v677_v18 = vadd.f32 %v676_v33, %v675_v7  ;;  %v622_v0 = vadd.f32 %v621_v55, %v620_v43  ;;  %v700_v33 = vsel %vm567_vm3, %v563_v32, 0.0 }
 0x122   :  { %v679_v29 = vadd.f32 %v678_v24, %v677_v18  ;;  %v624_v17 = vadd.f32 %v623_v60, %v622_v0  ;;  %v500_v13 = vpop.f32.mrf.mxu3  ;;  %v702_v18 = vsel %vm567_vm3, %v564_v27, 0.0 }
 0x123   :  { %v1092_v43 = vpop.eup %1091  ;;  %v566_v55 = vmax.f32 %v500_v13, 0.0 }
 0x124   :  { %v681_v37 = vadd.f32 %v680_v36, %v679_v29  ;;  %v626_v45 = vadd.f32 %v625_v63, %v624_v17  ;;  %v638_v0 = vmul.f32 256.0, %v1092_v43  ;;  %vm642_vm9 = vweird.f32 %v1092_v43 }
 0x125   :  { %v706_v25 = vsel %vm567_vm3, %v566_v55, 0.0 }
 0x126   :  { %v683_v47 = vadd.f32 %v682_v41, %v681_v37  ;;  %v628_v3 = vadd.f32 %v627_v19, %v626_v45  ;;  %v639_v29 = vsub.f32 1.0, %v638_v0 }
 0x128   :  { %v685_v52 = vadd.f32 %v684_v49, %v683_v47  ;;  %v630_v1 = vadd.f32 %v629_v46, %v628_v3  ;;  %v640_v35 = vmul.f32 %v1092_v43, %v639_v29 }
 0x12a   :  { %v687_v54 = vadd.f32 %v686_v10, %v685_v52  ;;  %v631_v50 = vrot.slane %v630_v1, 4  ;;  %v641_v45 = vadd.f32 %v1092_v43, %v640_v35 }
 0x12b   :  { %v1739_v59 = vpop.f32.mrf.mxu2 }
 0x12c   :  { %v689_v26 = vadd.f32 %v688_v58, %v687_v54  ;;  %v938_v56 = vmul.f32 %v1739_v59, %v1739_v59  ;;  %v632_v22 = vadd.f32 %v631_v50, %v630_v1  ;;  %v643_v47 = vsel %vm642_vm9, %v1092_v43, %v641_v45 }
 0x12e   :  { %v691_v62 = vadd.f32 %v690_v39, %v689_v26  ;;  %v940_v14 = vsel %vm939_vm8, %v938_v56, 0.0  ;;  %v633_v57 = vrot.slane %v632_v22, 2 }
 0x12f   :  { %941 = vadd.xlane.f32.xlu1 %v940_v14 }
 0x130   :  { %v693_v8 = vadd.f32 %v692_v44, %v691_v62  ;;  %v634_v36 = vadd.f32 %v633_v57, %v632_v22 }
 0x132   :  { %v695_v11 = vadd.f32 %v694_v48, %v693_v8  ;;  %v635_v37 = vrot.slane %v634_v36, 1 }
 0x134   :  { %v697_v9 = vadd.f32 %v696_v30, %v695_v11  ;;  %v636_v19 = vadd.f32 %v635_v37, %v634_v36 }
 0x136   :  { %v699_v7 = vadd.f32 %v698_v12, %v697_v9  ;;  %v644_v49 = vmul.f32 %v643_v47, %v636_v19 }
 0x138   :  { %v701_v53 = vadd.f32 %v700_v33, %v699_v7 }
 0x13a   :  { %v703_v24 = vadd.f32 %v702_v18, %v701_v53 }
 0x13c   :  { %v705_v60 = vadd.f32 %v704_v4, %v703_v24 }
 0x13e   :  { %v707_v23 = vadd.f32 %v706_v25, %v705_v60 }
 0x140   :  { %v708_v17 = vrot.slane %v707_v23, 4 }
 0x142   :  { %v709_v63 = vadd.f32 %v708_v17, %v707_v23 }
 0x144   :  { %v710_v15 = vrot.slane %v709_v63, 2 }
 0x146   :  { %v711_v41 = vadd.f32 %v710_v15, %v709_v63 }
 0x148   :  { %v712_v40 = vrot.slane %v711_v41, 1 }
 0x14a   :  { %v713_v3 = vadd.f32 %v712_v40, %v711_v41 }
 0x14c   :  { %v714_v28 = vmul.f32 %v713_v3, %v643_v47 }
 0x14e   :  { %v716_v46 = vsel %vm715_vm10, %v644_v49, %v714_v28 }
 0x14f   :  { %1065 = vmatmul.msk.f32.vlgmr.msrb.gmra.mxu1 %vm567_vm3, %v716_v46 }
 0x1a2   :  { %v942_v38 = vpop.xlane.xlu1 %941 }
 0x1a3   :  { %v943_v54 = vadd.f32 1e-12, %v942_v38 }
 0x1a5   :  { %1093 = vrsqrt.f32 %v943_v54  ;;  %vm950_vm3 = vweird.f32 %v943_v54 }
 0x1ab   :  { %v1094_v31 = vpop.eup %1093 }
 0x1ac   :  { %v945_v5 = vmul.f32 %v1094_v31, %v943_v54  ;;  %vm951_vm12 = vweird.f32 %v1094_v31 }
 0x1ad   :  { %vm952_vm14 = vmor %vm950_vm3, %vm951_vm12 }
 0x1ae   :  { %v946_v6 = vmul.f32 %v1094_v31, %v945_v5 }
 0x1b0   :  { %v947_v61 = vmul.f32 0.5, %v946_v6 }
 0x1b2   :  { %v948_v21 = vsub.f32 1.5, %v947_v61 }
 0x1b4   :  { %v949_v14 = vmul.f32 %v1094_v31, %v948_v21 }
 0x1b6   :  { %v953_v42 = vsel %vm952_vm14, %v1094_v31, %v949_v14 }
 0x1b7   :  { %v954_v48 = vmul.f32 %v953_v42, %v1739_v59 }
 0x1cc   :  { %v879_v52 = vpop.f32.mrf.mxu1 }
 0x1cd   :  { %v882_v1 = vmul.f32 %v879_v52, %v879_v52 }
 0x1cf   :  { %v884_v10 = vsel %vm883_vm11, %v882_v1, 0.0 }
 0x1d0   :  { %885 = vadd.xlane.f32.xlu2 %v884_v10 }
 0x243   :  { %v886_v51 = vpop.xlane.xlu2 %885 }
 0x244   :  { %v887_v58 = vadd.f32 1e-12, %v886_v51 }
 0x246   :  { %1095 = vrsqrt.f32 %v887_v58  ;;  %vm894_vm15 = vweird.f32 %v887_v58 }
 0x24c   :  { %v1096_v26 = vpop.eup %1095 }
 0x24d   :  { %v889_v56 = vmul.f32 %v1096_v26, %v887_v58  ;;  %vm895_vm13 = vweird.f32 %v1096_v26 }
 0x24e   :  { %vm896_vm0 = vmor %vm894_vm15, %vm895_vm13 }
 0x24f   :  { %v890_v39 = vmul.f32 %v1096_v26, %v889_v56 }
 0x251   :  { %v891_v62 = vmul.f32 0.5, %v890_v39 }
 0x253   :  { %v892_v2 = vsub.f32 1.5, %v891_v62 }
 0x255   :  { %v893_v44 = vmul.f32 %v1096_v26, %v892_v2 }
 0x257   :  { %v897_v34 = vsel %vm896_vm0, %v1096_v26, %v893_v44 }
 0x258   :  { %v898_v8 = vmul.f32 %v897_v34, %v879_v52 }
 0x25a   :  { %971 = vmatpush.xpose.msrb.mxu3 %v898_v8 }
 0x25d   :  { %972 = vmatmul.f32.vlgmr.msrb.gmra.mxu3 %v954_v48 }
 0x2e0   :  { %v973_v11 = vpop.f32.mrf.mxu3 }
 0x2e1   :  { %v977_v30 = vmul.f32 %v976_v16, %v973_v11 }
 0x2e3   :  { %v980_v32 = vsel %vm978_vm1, %v977_v30, -inf  ;;  %979 = vst.msk [vmem:[%s1785_s8] sm:$0xf] %vm978_vm1, %v977_v30 }
 0x2e4   :  { %981 = vmax.xlane.f32.xlu0 %v980_v32 }
 0x357   :  { %v982_v9 = vpop.xlane.xlu0 %981 }
 0x358   :  { %v983_v13 = vsub.f32 %v977_v30, %v982_v9 }
 0x35a   :  { %v984_v50 = vmul.f32 1.442695, %v983_v13 }
 0x35c   :  { %1097 = vpow2.f32 %v984_v50 }
 0x362   :  { %v1098_v59 = vpop.eup %1097 }
 0x363   :  { %v986_v12 = vsel %vm978_vm1, %v1098_v59, 0.0 }
 0x364   :  { %987 = vadd.xlane.f32.xlu2 %v986_v12 }
 0x3d7   :  { %v988_v27 = vpop.xlane.xlu2 %987 }
 0x3d8   :  { %1099 = vrcp.f32 %v988_v27 }
 0x3de   :  { %v1100_v43 = vpop.eup %1099 }
 0x3df   :  { %v990_v7 = vmul.f32 %v1100_v43, %v1098_v59 }
 0x3e1   :  { %991 = vst.msk [vmem:[%s1786_s7] sm:$0xf] %vm978_vm1, %v990_v7 }

</bundles_post_ra>
